<compile_context>
chip_gen: v7x
topology: tpu7x:2x2x1
jax: 0.10.0
libtpu: 0.0.40
codegen_flags: <defaults>
</compile_context>

<pallas_src>
import math
import jax
import jax.numpy as jnp
from jax.experimental import pallas as pl
from jax.experimental.pallas import tpu as pltpu

# --- small, module-consistent shapes ---
B, N, D = 2, 8, 32          # batch, seq len, d_model
H = 4                       # attention heads
HD = D // H                 # head dim
DFF = 64                    # feed-forward hidden dim
EPS = 1e-5                  # nn.LayerNorm default eps
VEC_W = 3 * D               # lane width of the packed weight slab (96)
SLAB_ROWS = 3 * D + 8       # wqkv(32) + vec(8) + w1(32) + [Wo^T|W2^T](32) = 104

# dot_general dimension numbers for "A @ B^T" (contract dim 1 of both operands).
_DN_T = (((1,), (1,)), ((), ()))


def _layernorm(x, gamma, beta):
    mu = jnp.mean(x, axis=-1, keepdims=True)
    var = jnp.mean((x - mu) ** 2, axis=-1, keepdims=True)
    return (x - mu) * jax.lax.rsqrt(var + EPS) * gamma + beta


def encoder_layer_kernel(x_ref, w_ref, out_ref):
    x = x_ref[0]                                    # (N, D) f32 — one sequence
    w = w_ref[...]                                  # (104, 96) packed weight slab

    # --- static sub-views of the packed slab (sublane offsets all /8) ---
    wqkv = w[0:D, :]                                # (D, 3D)
    vec = w[D:D + 8, :]                             # (8, 3D) vector params
    w1 = w[D + 8:2 * D + 8, 0:DFF]                  # (D, DFF)
    woT = w[2 * D + 8:3 * D + 8, 0:D]               # (D, D)   = Wo^T
    w2T = w[2 * D + 8:3 * D + 8, D:D + DFF]         # (D, DFF) = W2^T

    bqkv = vec[0:1, :]                              # (1, 3D)
    bo = vec[1:2, :D]
    b1 = vec[2:3, :DFF]
    b2 = vec[3:4, :D]
    g1 = vec[4:5, :D]
    be1 = vec[5:6, :D]
    g2 = vec[6:7, :D]
    be2 = vec[7:8, :D]

    # ---- LayerNorm 1 + fused QKV projection ----
    h1 = _layernorm(x, g1, be1)
    qkv = jnp.dot(h1, wqkv, preferred_element_type=jnp.float32) + bqkv
    q = qkv[:, 0 * D:1 * D]
    k = qkv[:, 1 * D:2 * D]
    v = qkv[:, 2 * D:3 * D]

    # ---- per-sequence multi-head attention (no mask needed) ----
    scale = 1.0 / math.sqrt(HD)
    attn = None
    for h in range(H):                              # static loop over heads
        qh = q[:, h * HD:(h + 1) * HD]              # (N, HD)
        kh = k[:, h * HD:(h + 1) * HD]
        vh = v[:, h * HD:(h + 1) * HD]
        s = jax.lax.dot_general(qh, kh, _DN_T,
                                preferred_element_type=jnp.float32) * scale
        s = s - jnp.max(s, axis=-1, keepdims=True)
        p = jnp.exp(s)
        p = p / jnp.sum(p, axis=-1, keepdims=True)  # exact softmax denominator
        oh = jnp.dot(p, vh, preferred_element_type=jnp.float32)        # (N, HD)
        # concat(o_0..o_H) @ Wo  ==  sum_h  o_h @ Wo[h*HD:(h+1)*HD, :]
        # Wo is stored transposed, so contract against matching Wo^T columns.
        ph = jax.lax.dot_general(oh, woT[:, h * HD:(h + 1) * HD], _DN_T,
                                 preferred_element_type=jnp.float32)   # (N, D)
        attn = ph if attn is None else attn + ph
    attn = attn + bo

    # Dropout -> identity (eval mode).
    out1 = attn + x

    # ---- LayerNorm 2 + feed-forward: Linear -> GELU(exact) -> Linear ----
    h2 = _layernorm(out1, g2, be2)
    f = jnp.dot(h2, w1, preferred_element_type=jnp.float32) + b1
    f = 0.5 * f * (1.0 + jax.lax.erf(f * (1.0 / math.sqrt(2.0))))
    f = jax.lax.dot_general(f, w2T, _DN_T,
                            preferred_element_type=jnp.float32) + b2

    out_ref[0] = (f + out1).astype(out_ref.dtype)


def _pack_params(params):
    """Pack all 16 PyTorch-style parameters into one (104, 96) DMA slab."""
    (wq, wk, wv, wo, bq, bk, bv, bo,
     w1, b1, w2, b2, g1, be1, g2, be2) = params
    wqkv = jnp.concatenate([wq, wk, wv], axis=1)              # (D, 3D)
    bqkv = jnp.concatenate([bq, bk, bv], axis=1)              # (1, 3D)

    def row(vrow):
        vrow = vrow.reshape(1, -1)
        return jnp.pad(vrow, ((0, 0), (0, VEC_W - vrow.shape[1])))

    vec = jnp.concatenate([row(bqkv), row(bo), row(b1), row(b2),
                           row(g1), row(be1), row(g2), row(be2)], axis=0)  # (8, 3D)
    w1p = jnp.pad(w1, ((0, 0), (0, VEC_W - DFF)))             # (D, 3D)
    wo_w2_t = jnp.concatenate([wo.T, w2.T], axis=1)           # (D, D+DFF) = (32, 96)
    slab = jnp.concatenate([wqkv, vec, w1p, wo_w2_t], axis=0)  # (104, 96)
    return slab


def encoder_layer(x, params):
    """x: (B, N, D) float32."""
    slab = _pack_params(params)

    cost = pl.CostEstimate(flops=300_000, transcendentals=1_600,
                           bytes_accessed=44_000)

    out = pl.pallas_call(
        encoder_layer_kernel,
        out_shape=jax.ShapeDtypeStruct((B, N, D), jnp.float32),
        grid_spec=pltpu.PrefetchScalarGridSpec(
            num_scalar_prefetch=0,
            grid=(B,),
            in_specs=[
                pl.BlockSpec((1, N, D), lambda b: (b, 0, 0)),
                # constant block index -> weights DMA'd once, stay resident
                pl.BlockSpec((SLAB_ROWS, VEC_W), lambda b: (0, 0)),
            ],
            out_specs=pl.BlockSpec((1, N, D), lambda b: (b, 0, 0)),
        ),
        compiler_params=pltpu.CompilerParams(
            dimension_semantics=("parallel",)),
        cost_estimate=cost,
    )(x, slab)
    return out


def _xavier_uniform(key, shape):
    fan_in, fan_out = shape[0], shape[1]
    bound = math.sqrt(6.0 / (fan_in + fan_out))
    return jax.random.uniform(key, shape, jnp.float32, -bound, bound)


def make_params(key):
    ks = jax.random.split(key, 6)
    # Attention projections (xavier uniform), biases zero (per module init).
    wq = _xavier_uniform(ks[0], (D, D))
    wk = _xavier_uniform(ks[1], (D, D))
    wv = _xavier_uniform(ks[2], (D, D))
    wo = _xavier_uniform(ks[3], (D, D))
    bq = bk = bv = bo = jnp.zeros((1, D), jnp.float32)
    # Feed-forward (xavier uniform), biases zero.
    w1 = _xavier_uniform(ks[4], (D, DFF))
    b1 = jnp.zeros((1, DFF), jnp.float32)
    w2 = _xavier_uniform(ks[5], (DFF, D))
    b2 = jnp.zeros((1, D), jnp.float32)
    # LayerNorms (default init: gamma=1, beta=0).
    g1 = jnp.ones((1, D), jnp.float32)
    be1 = jnp.zeros((1, D), jnp.float32)
    g2 = jnp.ones((1, D), jnp.float32)
    be2 = jnp.zeros((1, D), jnp.float32)
    return (wq, wk, wv, wo, bq, bk, bv, bo,
            w1, b1, w2, b2, g1, be1, g2, be2)


def encoder_layer_ref(x, params):
    """Pure-JAX reference mirroring the PyTorch forward (eval mode)."""
    (wq, wk, wv, wo, bq, bk, bv, bo,
     w1, b1, w2, b2, g1, be1, g2, be2) = params

    def ln(v, g, b):
        mu = jnp.mean(v, -1, keepdims=True)
        var = jnp.mean((v - mu) ** 2, -1, keepdims=True)
        return (v - mu) / jnp.sqrt(var + EPS) * g + b

    h1 = ln(x, g1, be1)
    q = h1 @ wq + bq
    k = h1 @ wk + bk
    v = h1 @ wv + bv
    qh = q.reshape(B, N, H, HD).transpose(0, 2, 1, 3)
    kh = k.reshape(B, N, H, HD).transpose(0, 2, 1, 3)
    vh = v.reshape(B, N, H, HD).transpose(0, 2, 1, 3)
    s = jnp.einsum('bhqd,bhkd->bhqk', qh, kh) / math.sqrt(HD)
    p = jax.nn.softmax(s, axis=-1)
    o = jnp.einsum('bhqk,bhkd->bhqd', p, vh).transpose(0, 2, 1, 3).reshape(B, N, D)
    attn = o @ wo + bo
    out1 = attn + x
    h2 = ln(out1, g2, be2)
    f = h2 @ w1 + b1
    f = 0.5 * f * (1.0 + jax.lax.erf(f / math.sqrt(2.0)))
    return (f @ w2 + b2) + out1


if __name__ == "__main__":
    key = jax.random.PRNGKey(0)
    k_x, k_p = jax.random.split(key)
    x = jax.random.normal(k_x, (B, N, D), jnp.float32)
    params = make_params(k_p)

    out = encoder_layer(x, params)
    jax.block_until_ready(out)

    assert out.shape == (B, N, D) and out.dtype == jnp.float32
    assert bool(jnp.all(jnp.isfinite(out)))
    ref = encoder_layer_ref(x, params)
    assert bool(jnp.allclose(out, ref, atol=2e-3, rtol=2e-3))
    print("KERNEL_OK")
</pallas_src>

<mosaic_0001>
module attributes {stable_mosaic.version = 11 : i64} {
  func.func @encoder_layer_kernel(%arg0: i32, %arg1: memref<1x8x32xf32, #tpu.memory_space<vmem>>, %arg2: memref<104x96xf32, #tpu.memory_space<vmem>>, %arg3: memref<1x8x32xf32, #tpu.memory_space<vmem>>) attributes {dimension_semantics = [#tpu.dimension_semantics<parallel>], iteration_bounds = array<i64: 2>, scalar_prefetch = 0 : i64, scratch_operands = 0 : i64, tpu.core_type = #tpu.core_type<tc>, window_params = [{transform_indices = @transform_0, window_bounds = array<i64: 1, 8, 32>}, {pipeline_mode = #tpu.pipeline_mode<synchronous>, transform_indices = @transform_1, window_bounds = array<i64: 104, 96>}, {transform_indices = @transform_2, window_bounds = array<i64: 1, 8, 32>}]} {
    %c0 = arith.constant 0 : index
    %c0_0 = arith.constant 0 : index
    %c0_1 = arith.constant 0 : index
    %0 = vector.load %arg1[%c0, %c0_0, %c0_1] : memref<1x8x32xf32, #tpu.memory_space<vmem>>, vector<1x8x32xf32>
    %1 = vector.shape_cast %0 : vector<1x8x32xf32> to vector<8x32xf32>
    %c0_2 = arith.constant 0 : index
    %c0_3 = arith.constant 0 : index
    %2 = vector.load %arg2[%c0_2, %c0_3] : memref<104x96xf32, #tpu.memory_space<vmem>>, vector<104x96xf32>
    %3 = vector.extract_strided_slice %2 {offsets = [0, 0], sizes = [32, 96], strides = [1, 1]} : vector<104x96xf32> to vector<32x96xf32>
    %4 = vector.extract_strided_slice %2 {offsets = [32, 0], sizes = [8, 96], strides = [1, 1]} : vector<104x96xf32> to vector<8x96xf32>
    %5 = vector.extract_strided_slice %2 {offsets = [40, 0], sizes = [32, 64], strides = [1, 1]} : vector<104x96xf32> to vector<32x64xf32>
    %6 = vector.extract_strided_slice %2 {offsets = [72, 0], sizes = [32, 32], strides = [1, 1]} : vector<104x96xf32> to vector<32x32xf32>
    %7 = vector.extract_strided_slice %2 {offsets = [72, 32], sizes = [32, 64], strides = [1, 1]} : vector<104x96xf32> to vector<32x64xf32>
    %8 = vector.extract_strided_slice %4 {offsets = [0, 0], sizes = [1, 96], strides = [1, 1]} : vector<8x96xf32> to vector<1x96xf32>
    %9 = vector.extract_strided_slice %4 {offsets = [1, 0], sizes = [1, 32], strides = [1, 1]} : vector<8x96xf32> to vector<1x32xf32>
    %10 = vector.extract_strided_slice %4 {offsets = [2, 0], sizes = [1, 64], strides = [1, 1]} : vector<8x96xf32> to vector<1x64xf32>
    %11 = vector.extract_strided_slice %4 {offsets = [3, 0], sizes = [1, 32], strides = [1, 1]} : vector<8x96xf32> to vector<1x32xf32>
    %12 = vector.extract_strided_slice %4 {offsets = [4, 0], sizes = [1, 32], strides = [1, 1]} : vector<8x96xf32> to vector<1x32xf32>
    %13 = vector.extract_strided_slice %4 {offsets = [5, 0], sizes = [1, 32], strides = [1, 1]} : vector<8x96xf32> to vector<1x32xf32>
    %14 = vector.extract_strided_slice %4 {offsets = [6, 0], sizes = [1, 32], strides = [1, 1]} : vector<8x96xf32> to vector<1x32xf32>
    %15 = vector.extract_strided_slice %4 {offsets = [7, 0], sizes = [1, 32], strides = [1, 1]} : vector<8x96xf32> to vector<1x32xf32>
    %cst = arith.constant dense<0.000000e+00> : vector<8xf32>
    %16 = vector.multi_reduction <add>, %1, %cst [1] : vector<8x32xf32> to vector<8xf32>
    %17 = vector.shape_cast %16 : vector<8xf32> to vector<8x1xf32>
    %cst_4 = arith.constant 3.200000e+01 : f32
    %18 = vector.broadcast %cst_4 : f32 to vector<8x1xf32>
    %19 = arith.divf %17, %18 : vector<8x1xf32>
    %20 = vector.broadcast %19 : vector<8x1xf32> to vector<8x32xf32>
    %21 = arith.subf %1, %20 : vector<8x32xf32>
    %22 = arith.mulf %21, %21 : vector<8x32xf32>
    %cst_5 = arith.constant dense<0.000000e+00> : vector<8xf32>
    %23 = vector.multi_reduction <add>, %22, %cst_5 [1] : vector<8x32xf32> to vector<8xf32>
    %24 = vector.shape_cast %23 : vector<8xf32> to vector<8x1xf32>
    %cst_6 = arith.constant 3.200000e+01 : f32
    %25 = vector.broadcast %cst_6 : f32 to vector<8x1xf32>
    %26 = arith.divf %24, %25 : vector<8x1xf32>
    %27 = vector.broadcast %19 : vector<8x1xf32> to vector<8x32xf32>
    %28 = arith.subf %1, %27 : vector<8x32xf32>
    %cst_7 = arith.constant 9.99999974E-6 : f32
    %29 = vector.broadcast %cst_7 : f32 to vector<8x1xf32>
    %30 = arith.addf %26, %29 : vector<8x1xf32>
    %31 = math.rsqrt %30 : vector<8x1xf32>
    %32 = vector.broadcast %31 : vector<8x1xf32> to vector<8x32xf32>
    %33 = arith.mulf %28, %32 : vector<8x32xf32>
    %34 = vector.broadcast %12 : vector<1x32xf32> to vector<8x32xf32>
    %35 = arith.mulf %33, %34 : vector<8x32xf32>
    %36 = vector.broadcast %13 : vector<1x32xf32> to vector<8x32xf32>
    %37 = arith.addf %35, %36 : vector<8x32xf32>
    %cst_8 = arith.constant dense<0.000000e+00> : vector<8x96xf32>
    %38 = tpu.matmul %37, %3, %cst_8 {dimension_numbers = #tpu.dot_dimension_numbers<[1], [0], [0], [1], [0, 0, 1, 1], [], []>} : vector<8x32xf32>, vector<32x96xf32>, vector<8x96xf32> -> vector<8x96xf32>
    %39 = vector.broadcast %8 : vector<1x96xf32> to vector<8x96xf32>
    %40 = arith.addf %38, %39 : vector<8x96xf32>
    %41 = vector.extract_strided_slice %40 {offsets = [0, 0], sizes = [8, 32], strides = [1, 1]} : vector<8x96xf32> to vector<8x32xf32>
    %42 = vector.extract_strided_slice %40 {offsets = [0, 32], sizes = [8, 32], strides = [1, 1]} : vector<8x96xf32> to vector<8x32xf32>
    %43 = vector.extract_strided_slice %40 {offsets = [0, 64], sizes = [8, 32], strides = [1, 1]} : vector<8x96xf32> to vector<8x32xf32>
    %44 = vector.extract_strided_slice %41 {offsets = [0, 0], sizes = [8, 8], strides = [1, 1]} : vector<8x32xf32> to vector<8x8xf32>
    %45 = vector.extract_strided_slice %42 {offsets = [0, 0], sizes = [8, 8], strides = [1, 1]} : vector<8x32xf32> to vector<8x8xf32>
    %46 = vector.extract_strided_slice %43 {offsets = [0, 0], sizes = [8, 8], strides = [1, 1]} : vector<8x32xf32> to vector<8x8xf32>
    %cst_9 = arith.constant dense<0.000000e+00> : vector<8x8xf32>
    %47 = tpu.matmul %44, %45, %cst_9 {dimension_numbers = #tpu.dot_dimension_numbers<[1], [1], [0], [0], [0, 0, 1, 0], [], []>} : vector<8x8xf32>, vector<8x8xf32>, vector<8x8xf32> -> vector<8x8xf32>
    %cst_10 = arith.constant 0.353553385 : f32
    %48 = vector.broadcast %cst_10 : f32 to vector<8x8xf32>
    %49 = arith.mulf %47, %48 : vector<8x8xf32>
    %cst_11 = arith.constant dense<0xFF800000> : vector<8xf32>
    %50 = vector.multi_reduction <maximumf>, %49, %cst_11 [1] : vector<8x8xf32> to vector<8xf32>
    %51 = vector.shape_cast %50 : vector<8xf32> to vector<8x1xf32>
    %52 = vector.broadcast %51 : vector<8x1xf32> to vector<8x8xf32>
    %53 = arith.subf %49, %52 : vector<8x8xf32>
    %54 = math.exp %53 : vector<8x8xf32>
    %cst_12 = arith.constant dense<0.000000e+00> : vector<8xf32>
    %55 = vector.multi_reduction <add>, %54, %cst_12 [1] : vector<8x8xf32> to vector<8xf32>
    %56 = vector.shape_cast %55 : vector<8xf32> to vector<8x1xf32>
    %57 = vector.broadcast %56 : vector<8x1xf32> to vector<8x8xf32>
    %58 = arith.divf %54, %57 : vector<8x8xf32>
    %cst_13 = arith.constant dense<0.000000e+00> : vector<8x8xf32>
    %59 = tpu.matmul %58, %46, %cst_13 {dimension_numbers = #tpu.dot_dimension_numbers<[1], [0], [0], [1], [0, 0, 1, 1], [], []>} : vector<8x8xf32>, vector<8x8xf32>, vector<8x8xf32> -> vector<8x8xf32>
    %60 = vector.extract_strided_slice %6 {offsets = [0, 0], sizes = [32, 8], strides = [1, 1]} : vector<32x32xf32> to vector<32x8xf32>
    %cst_14 = arith.constant dense<0.000000e+00> : vector<8x32xf32>
    %61 = tpu.matmul %59, %60, %cst_14 {dimension_numbers = #tpu.dot_dimension_numbers<[1], [1], [0], [0], [0, 0, 1, 0], [], []>} : vector<8x8xf32>, vector<32x8xf32>, vector<8x32xf32> -> vector<8x32xf32>
    %62 = vector.extract_strided_slice %41 {offsets = [0, 8], sizes = [8, 8], strides = [1, 1]} : vector<8x32xf32> to vector<8x8xf32>
    %63 = vector.extract_strided_slice %42 {offsets = [0, 8], sizes = [8, 8], strides = [1, 1]} : vector<8x32xf32> to vector<8x8xf32>
    %64 = vector.extract_strided_slice %43 {offsets = [0, 8], sizes = [8, 8], strides = [1, 1]} : vector<8x32xf32> to vector<8x8xf32>
    %cst_15 = arith.constant dense<0.000000e+00> : vector<8x8xf32>
    %65 = tpu.matmul %62, %63, %cst_15 {dimension_numbers = #tpu.dot_dimension_numbers<[1], [1], [0], [0], [0, 0, 1, 0], [], []>} : vector<8x8xf32>, vector<8x8xf32>, vector<8x8xf32> -> vector<8x8xf32>
    %cst_16 = arith.constant 0.353553385 : f32
    %66 = vector.broadcast %cst_16 : f32 to vector<8x8xf32>
    %67 = arith.mulf %65, %66 : vector<8x8xf32>
    %cst_17 = arith.constant dense<0xFF800000> : vector<8xf32>
    %68 = vector.multi_reduction <maximumf>, %67, %cst_17 [1] : vector<8x8xf32> to vector<8xf32>
    %69 = vector.shape_cast %68 : vector<8xf32> to vector<8x1xf32>
    %70 = vector.broadcast %69 : vector<8x1xf32> to vector<8x8xf32>
    %71 = arith.subf %67, %70 : vector<8x8xf32>
    %72 = math.exp %71 : vector<8x8xf32>
    %cst_18 = arith.constant dense<0.000000e+00> : vector<8xf32>
    %73 = vector.multi_reduction <add>, %72, %cst_18 [1] : vector<8x8xf32> to vector<8xf32>
    %74 = vector.shape_cast %73 : vector<8xf32> to vector<8x1xf32>
    %75 = vector.broadcast %74 : vector<8x1xf32> to vector<8x8xf32>
    %76 = arith.divf %72, %75 : vector<8x8xf32>
    %cst_19 = arith.constant dense<0.000000e+00> : vector<8x8xf32>
    %77 = tpu.matmul %76, %64, %cst_19 {dimension_numbers = #tpu.dot_dimension_numbers<[1], [0], [0], [1], [0, 0, 1, 1], [], []>} : vector<8x8xf32>, vector<8x8xf32>, vector<8x8xf32> -> vector<8x8xf32>
    %78 = vector.extract_strided_slice %6 {offsets = [0, 8], sizes = [32, 8], strides = [1, 1]} : vector<32x32xf32> to vector<32x8xf32>
    %cst_20 = arith.constant dense<0.000000e+00> : vector<8x32xf32>
    %79 = tpu.matmul %77, %78, %cst_20 {dimension_numbers = #tpu.dot_dimension_numbers<[1], [1], [0], [0], [0, 0, 1, 0], [], []>} : vector<8x8xf32>, vector<32x8xf32>, vector<8x32xf32> -> vector<8x32xf32>
    %80 = arith.addf %61, %79 : vector<8x32xf32>
    %81 = vector.extract_strided_slice %41 {offsets = [0, 16], sizes = [8, 8], strides = [1, 1]} : vector<8x32xf32> to vector<8x8xf32>
    %82 = vector.extract_strided_slice %42 {offsets = [0, 16], sizes = [8, 8], strides = [1, 1]} : vector<8x32xf32> to vector<8x8xf32>
    %83 = vector.extract_strided_slice %43 {offsets = [0, 16], sizes = [8, 8], strides = [1, 1]} : vector<8x32xf32> to vector<8x8xf32>
    %cst_21 = arith.constant dense<0.000000e+00> : vector<8x8xf32>
    %84 = tpu.matmul %81, %82, %cst_21 {dimension_numbers = #tpu.dot_dimension_numbers<[1], [1], [0], [0], [0, 0, 1, 0], [], []>} : vector<8x8xf32>, vector<8x8xf32>, vector<8x8xf32> -> vector<8x8xf32>
    %cst_22 = arith.constant 0.353553385 : f32
    %85 = vector.broadcast %cst_22 : f32 to vector<8x8xf32>
    %86 = arith.mulf %84, %85 : vector<8x8xf32>
    %cst_23 = arith.constant dense<0xFF800000> : vector<8xf32>
    %87 = vector.multi_reduction <maximumf>, %86, %cst_23 [1] : vector<8x8xf32> to vector<8xf32>
    %88 = vector.shape_cast %87 : vector<8xf32> to vector<8x1xf32>
    %89 = vector.broadcast %88 : vector<8x1xf32> to vector<8x8xf32>
    %90 = arith.subf %86, %89 : vector<8x8xf32>
    %91 = math.exp %90 : vector<8x8xf32>
    %cst_24 = arith.constant dense<0.000000e+00> : vector<8xf32>
    %92 = vector.multi_reduction <add>, %91, %cst_24 [1] : vector<8x8xf32> to vector<8xf32>
    %93 = vector.shape_cast %92 : vector<8xf32> to vector<8x1xf32>
    %94 = vector.broadcast %93 : vector<8x1xf32> to vector<8x8xf32>
    %95 = arith.divf %91, %94 : vector<8x8xf32>
    %cst_25 = arith.constant dense<0.000000e+00> : vector<8x8xf32>
    %96 = tpu.matmul %95, %83, %cst_25 {dimension_numbers = #tpu.dot_dimension_numbers<[1], [0], [0], [1], [0, 0, 1, 1], [], []>} : vector<8x8xf32>, vector<8x8xf32>, vector<8x8xf32> -> vector<8x8xf32>
    %97 = vector.extract_strided_slice %6 {offsets = [0, 16], sizes = [32, 8], strides = [1, 1]} : vector<32x32xf32> to vector<32x8xf32>
    %cst_26 = arith.constant dense<0.000000e+00> : vector<8x32xf32>
    %98 = tpu.matmul %96, %97, %cst_26 {dimension_numbers = #tpu.dot_dimension_numbers<[1], [1], [0], [0], [0, 0, 1, 0], [], []>} : vector<8x8xf32>, vector<32x8xf32>, vector<8x32xf32> -> vector<8x32xf32>
    %99 = arith.addf %80, %98 : vector<8x32xf32>
    %100 = vector.extract_strided_slice %41 {offsets = [0, 24], sizes = [8, 8], strides = [1, 1]} : vector<8x32xf32> to vector<8x8xf32>
    %101 = vector.extract_strided_slice %42 {offsets = [0, 24], sizes = [8, 8], strides = [1, 1]} : vector<8x32xf32> to vector<8x8xf32>
    %102 = vector.extract_strided_slice %43 {offsets = [0, 24], sizes = [8, 8], strides = [1, 1]} : vector<8x32xf32> to vector<8x8xf32>
    %cst_27 = arith.constant dense<0.000000e+00> : vector<8x8xf32>
    %103 = tpu.matmul %100, %101, %cst_27 {dimension_numbers = #tpu.dot_dimension_numbers<[1], [1], [0], [0], [0, 0, 1, 0], [], []>} : vector<8x8xf32>, vector<8x8xf32>, vector<8x8xf32> -> vector<8x8xf32>
    %cst_28 = arith.constant 0.353553385 : f32
    %104 = vector.broadcast %cst_28 : f32 to vector<8x8xf32>
    %105 = arith.mulf %103, %104 : vector<8x8xf32>
    %cst_29 = arith.constant dense<0xFF800000> : vector<8xf32>
    %106 = vector.multi_reduction <maximumf>, %105, %cst_29 [1] : vector<8x8xf32> to vector<8xf32>
    %107 = vector.shape_cast %106 : vector<8xf32> to vector<8x1xf32>
    %108 = vector.broadcast %107 : vector<8x1xf32> to vector<8x8xf32>
    %109 = arith.subf %105, %108 : vector<8x8xf32>
    %110 = math.exp %109 : vector<8x8xf32>
    %cst_30 = arith.constant dense<0.000000e+00> : vector<8xf32>
    %111 = vector.multi_reduction <add>, %110, %cst_30 [1] : vector<8x8xf32> to vector<8xf32>
    %112 = vector.shape_cast %111 : vector<8xf32> to vector<8x1xf32>
    %113 = vector.broadcast %112 : vector<8x1xf32> to vector<8x8xf32>
    %114 = arith.divf %110, %113 : vector<8x8xf32>
    %cst_31 = arith.constant dense<0.000000e+00> : vector<8x8xf32>
    %115 = tpu.matmul %114, %102, %cst_31 {dimension_numbers = #tpu.dot_dimension_numbers<[1], [0], [0], [1], [0, 0, 1, 1], [], []>} : vector<8x8xf32>, vector<8x8xf32>, vector<8x8xf32> -> vector<8x8xf32>
    %116 = vector.extract_strided_slice %6 {offsets = [0, 24], sizes = [32, 8], strides = [1, 1]} : vector<32x32xf32> to vector<32x8xf32>
    %cst_32 = arith.constant dense<0.000000e+00> : vector<8x32xf32>
    %117 = tpu.matmul %115, %116, %cst_32 {dimension_numbers = #tpu.dot_dimension_numbers<[1], [1], [0], [0], [0, 0, 1, 0], [], []>} : vector<8x8xf32>, vector<32x8xf32>, vector<8x32xf32> -> vector<8x32xf32>
    %118 = arith.addf %99, %117 : vector<8x32xf32>
    %119 = vector.broadcast %9 : vector<1x32xf32> to vector<8x32xf32>
    %120 = arith.addf %118, %119 : vector<8x32xf32>
    %121 = arith.addf %120, %1 : vector<8x32xf32>
    %cst_33 = arith.constant dense<0.000000e+00> : vector<8xf32>
    %122 = vector.multi_reduction <add>, %121, %cst_33 [1] : vector<8x32xf32> to vector<8xf32>
    %123 = vector.shape_cast %122 : vector<8xf32> to vector<8x1xf32>
    %cst_34 = arith.constant 3.200000e+01 : f32
    %124 = vector.broadcast %cst_34 : f32 to vector<8x1xf32>
    %125 = arith.divf %123, %124 : vector<8x1xf32>
    %126 = vector.broadcast %125 : vector<8x1xf32> to vector<8x32xf32>
    %127 = arith.subf %121, %126 : vector<8x32xf32>
    %128 = arith.mulf %127, %127 : vector<8x32xf32>
    %cst_35 = arith.constant dense<0.000000e+00> : vector<8xf32>
    %129 = vector.multi_reduction <add>, %128, %cst_35 [1] : vector<8x32xf32> to vector<8xf32>
    %130 = vector.shape_cast %129 : vector<8xf32> to vector<8x1xf32>
    %cst_36 = arith.constant 3.200000e+01 : f32
    %131 = vector.broadcast %cst_36 : f32 to vector<8x1xf32>
    %132 = arith.divf %130, %131 : vector<8x1xf32>
    %133 = vector.broadcast %125 : vector<8x1xf32> to vector<8x32xf32>
    %134 = arith.subf %121, %133 : vector<8x32xf32>
    %cst_37 = arith.constant 9.99999974E-6 : f32
    %135 = vector.broadcast %cst_37 : f32 to vector<8x1xf32>
    %136 = arith.addf %132, %135 : vector<8x1xf32>
    %137 = math.rsqrt %136 : vector<8x1xf32>
    %138 = vector.broadcast %137 : vector<8x1xf32> to vector<8x32xf32>
    %139 = arith.mulf %134, %138 : vector<8x32xf32>
    %140 = vector.broadcast %14 : vector<1x32xf32> to vector<8x32xf32>
    %141 = arith.mulf %139, %140 : vector<8x32xf32>
    %142 = vector.broadcast %15 : vector<1x32xf32> to vector<8x32xf32>
    %143 = arith.addf %141, %142 : vector<8x32xf32>
    %cst_38 = arith.constant dense<0.000000e+00> : vector<8x64xf32>
    %144 = tpu.matmul %143, %5, %cst_38 {dimension_numbers = #tpu.dot_dimension_numbers<[1], [0], [0], [1], [0, 0, 1, 1], [], []>} : vector<8x32xf32>, vector<32x64xf32>, vector<8x64xf32> -> vector<8x64xf32>
    %145 = vector.broadcast %10 : vector<1x64xf32> to vector<8x64xf32>
    %146 = arith.addf %144, %145 : vector<8x64xf32>
    %cst_39 = arith.constant 5.000000e-01 : f32
    %147 = vector.broadcast %cst_39 : f32 to vector<8x64xf32>
    %148 = arith.mulf %147, %146 : vector<8x64xf32>
    %cst_40 = arith.constant 0.707106769 : f32
    %149 = vector.broadcast %cst_40 : f32 to vector<8x64xf32>
    %150 = arith.mulf %146, %149 : vector<8x64xf32>
    %151 = math.erf %150 : vector<8x64xf32>
    %cst_41 = arith.constant 1.000000e+00 : f32
    %152 = vector.broadcast %cst_41 : f32 to vector<8x64xf32>
    %153 = arith.addf %152, %151 : vector<8x64xf32>
    %154 = arith.mulf %148, %153 : vector<8x64xf32>
    %cst_42 = arith.constant dense<0.000000e+00> : vector<8x32xf32>
    %155 = tpu.matmul %154, %7, %cst_42 {dimension_numbers = #tpu.dot_dimension_numbers<[1], [1], [0], [0], [0, 0, 1, 0], [], []>} : vector<8x64xf32>, vector<32x64xf32>, vector<8x32xf32> -> vector<8x32xf32>
    %156 = vector.broadcast %11 : vector<1x32xf32> to vector<8x32xf32>
    %157 = arith.addf %155, %156 : vector<8x32xf32>
    %158 = arith.addf %157, %121 : vector<8x32xf32>
    %c0_43 = arith.constant 0 : index
    %c0_44 = arith.constant 0 : index
    %c0_45 = arith.constant 0 : index
    %159 = vector.load %arg3[%c0_43, %c0_44, %c0_45] : memref<1x8x32xf32, #tpu.memory_space<vmem>>, vector<1x8x32xf32>
    %160 = vector.shape_cast %159 : vector<1x8x32xf32> to vector<8x32xf32>
    %161 = vector.shape_cast %158 : vector<8x32xf32> to vector<1x8x32xf32>
    tpu.vector_store %arg3[%c0_43, %c0_44, %c0_45], %161 {strides = array<i32>} : memref<1x8x32xf32, #tpu.memory_space<vmem>>, vector<1x8x32xf32>,
    return
  }
  func.func @transform_0(%arg0: i32) -> (i32, i32, i32) {
    %c0_i32 = arith.constant 0 : i32
    %c0_i32_0 = arith.constant 0 : i32
    %c0_i32_1 = arith.constant 0 : i32
    return %arg0, %c0_i32, %c0_i32_0 : i32, i32, i32
  }
  func.func @transform_1(%arg0: i32) -> (i32, i32) {
    %c0_i32 = arith.constant 0 : i32
    %c0_i32_0 = arith.constant 0 : i32
    %c0_i32_1 = arith.constant 0 : i32
    return %c0_i32, %c0_i32_0 : i32, i32
  }
  func.func @transform_2(%arg0: i32) -> (i32, i32, i32) {
    %c0_i32 = arith.constant 0 : i32
    %c0_i32_0 = arith.constant 0 : i32
    %c0_i32_1 = arith.constant 0 : i32
    return %arg0, %c0_i32, %c0_i32_0 : i32, i32, i32
  }
}

</mosaic_0001>

<bundles_post_ra>
// kernel: tpu_custom_call.1
= control target key start
LH: loop header
LB: loop body
LE: loop exit
PB: predicated region body
PF: predicated region fallthrough
CT: control target
= control target key end

     0   :  { %7 = vsyncpa [#allocation3], 0  ;;  %s2349_s0 = inlined_call_operand.vmem [shape: f32[2,8,32], index: 0, kind: input, shape index: {}]   ;;  %s2350_s1 = inlined_call_operand.vmem [shape: f32[104,96], index: 1, kind: input, shape index: {}]   ;;  %s2351_s2 = inlined_call_operand.hbm [shape: f32[2,8,32], index: 2, kind: output, shape index: {}]  }
   0x1   :  { %9 = vsyncpa [#allocation3 + $0x1], 0  ;;  %s2031_s9 = smov 0   ;;  %s2033_s10 = smov 0  }
   0x2   :  { %s2035_s11 = smov 0   ;;  %s2037_s12 = smov 0  }
   0x3 LB: > { %s2052_s13 = sadd.s32 4294967295, %s1999_s12   ;;  %s1553_s14 = sadd.s32 4294967294, %s1999_s12   ;;  %s1999_s12 = sphi %s2037_s12, %s2359_s12   ;;  %s1995_s11 = sphi %s2035_s11, %s2358_s11   ;;  %s1991_s10 = sphi %s2033_s10, %s2357_s10   ;;  %s1987_s9 = sphi %s2031_s9, %s2356_s9  }
   0x4   : > { %s2056_s15 = sadd.s32 1, %s1999_s12   ;;  %s69_s16 = sadd.s32 1, %s1995_s11 }
   0x5   : > { %s66_s17 = ssub.s32 %s1999_s12, %s2056_s15  ;;  %p79_p0 = scmp.ne.s32.totalorder %s1995_s11, %s1991_s10 }
   0x6   : > { %p67_p1 = scmp.eq.s32.totalorder %s66_s17, 0  ;;  %p80_p2 = scmp.eq.s32.totalorder %s2052_s13, 1 }
   0x7   : > { %p85_p3 = scmp.ne.s32.totalorder %s1991_s10, %s1987_s9  ;;  %p86_p4 = scmp.eq.s32.totalorder %s1553_s14, 1 }
   0x8   : > { %s2067_s18 = scalar_select %p67_p1, %s1995_s11, %s69_s16  }
   0x9   : > { %p2069_p5 = por %p80_p2, %p79_p0  ;;  %p2073_p6 = por %p86_p4, %p85_p3 }
   0xa   : > { %p1556_p7 = scmp.ge.s32.totalorder %s1999_s12, 1  ;;  %p114_p8 = scmp.lt.s32.totalorder %s1999_s12, 3 }
   0xc   : > { %p115_p9 = pnand %p1556_p7, %p114_p8 }
   0xd   : > { %p135_p10 = scmp.lt.s32.totalorder (!%p115_p9), %s2052_s13, 1  ;;  %vm153_vm0 = vcmask (!%p115_p9), 261120   ;;  %v140_v7 = vld [vmem:[%s2350_s1] sm:$0xff] (!%p115_p9)  ;;  %v141_v8 = vld [vmem:[%s2350_s1 + $0x8] sm:$0xff] (!%p115_p9)  ;;  %v142_v9 = vld [vmem:[%s2350_s1 + $0x10] sm:$0xff] (!%p115_p9)  ;;  %v2001_v10 = vmov (!%p115_p9), 0.0|0.0   ;;  %v168_v17 = vlaneseq (!%p115_p9) }
   0xe   : > { %118 = sbr.rel (%p115_p9) target bundleno = 3683 (0xe63), region = 28  ;;  %1770 = vmatprep.subr.bf16.mxu1 (!%p115_p9), %v2001_v10  ;;  %v1771_v11 = vpack.c.bf16 (!%p115_p9), %v141_v8, %v140_v7  ;;  %v143_v12 = vld [vmem:[%s2350_s1 + $0x18] sm:$0xff] (!%p115_p9)  ;;  %vm2002_vm1 = vmmov (!%p115_p9), 0   ;;  %v2003_v13 = vmov (!%p115_p9), 0.0   ;;  %v2116_v21 = vld [vmem:[%s2350_s1 + $0x20] sm:$0xff] (!%p115_p9)  ;;  %s2004_s8 = smov (!%p115_p9), 120  }
   0xf   : > { %1661 = vmatprep.mubr.msk.f32.mxu1 (!%p115_p9), %vm2002_vm1, %v2003_v13  ;;  %1674 = vmatprep.subr.mxu0 (!%p115_p9), %v2003_v13  ;;  %v1774_v14 = vpack.c.bf16 (!%p115_p9), %v143_v12, %v142_v9  ;;  %v2110_v19 = vshrl.u32 (!%p115_p9), %v168_v17, 7  ;;  %s2005_s14 = smov (!%p115_p9), 96   ;;  %s2006_s16 = smov (!%p115_p9), 88   ;;  %vm258_vm2 = vcmask (!%p115_p9), 64512   ;;  %v149_v55 = vld [vmem:[%s2350_s1 + $0x48] sm:$0xff] (!%p115_p9)  ;;  %v150_v56 = vld [vmem:[%s2350_s1 + $0x50] sm:$0xff] (!%p115_p9) }
  0x10   : > { %1676 = vmatprep.mubr.msk.f32.mxu0 (!%p115_p9), %vm2002_vm1, %v2003_v13  ;;  %1772 = vmatpush3.bf16.msra.mxu1 (!%p115_p9), %v1771_v11  ;;  %s2007_s17 = smov (!%p115_p9), 56   ;;  %v2156_v57 = vpack.i.bf16 (!%p115_p9), %v150_v56, %v149_v55  ;;  %v151_v58 = vld [vmem:[%s2350_s1 + $0x58] sm:$0xff] (!%p115_p9)  ;;  %v152_v59 = vld [vmem:[%s2350_s1 + $0x60] sm:$0xff] (!%p115_p9)  ;;  %s2009_s30 = smov (!%p115_p9), 80   ;;  %vm2180_vm3 = vmpackc.low (!%p115_p9), %vm258_vm2, %vm258_vm2  ;;  %vm1396_vm4 = vcmask (!%p115_p9), 523264  }
  0x11   : > { %1773 = vmatprep.subr.bf16.mxu1 (!%p115_p9), %v2001_v10  ;;  %v170_v20 = vsub.s32 (!%p115_p9), 4, %v2110_v19  ;;  %v175_v22 = vsub.s32 (!%p115_p9), 5, %v2110_v19  ;;  %v180_v29 = vsub.s32 (!%p115_p9), 0, %v2110_v19  ;;  %v2166_v60 = vpack.i.bf16 (!%p115_p9), %v152_v59, %v151_v58  ;;  %s2010_s3 = smov (!%p115_p9), 112   ;;  %s2011_s4 = smov (!%p115_p9), 48   ;;  %vm1816_vm5 = vmpackc.low (!%p115_p9), %vm1396_vm4, %vm1396_vm4 }
  0x12   : > { %s2012_s5 = smov (!%p115_p9), 104   ;;  %s2013_s6 = smov (!%p115_p9), 72  }
  0x13   : > { %v171_v23 = vrot.slane (!%p115_p9), %v2116_v21, %v170_v20  ;;  %v176_v26 = vrot.slane (!%p115_p9), %v2116_v21, %v175_v22  ;;  %v181_v30 = vrot.slane (!%p115_p9), %v2116_v21, %v180_v29  ;;  %s2014_s7 = smov (!%p115_p9), 40   ;;  %s1599_s27 = sshll.u32 (!%p115_p9), %s2052_s13, 7 }
  0x14   : > { %1775 = vmatpush3.bf16.msra.mxu1 (!%p115_p9), %v1774_v14 }
  0x15   : > { %s136_s21 = scalar_select %p135_p10, %s2052_s13, 1  ;;  %1664 = vmatprep.subr.mxu1 %v2003_v13 }
  0x17   : > { %s1558_s22 = sshll.u32 %s136_s21, 3 }
  0x18   : > { %s138_s25 = scalar_lea.vmem %s2349_s0, %s1558_s22 }
  0x19   : > { %v2084_v0 = vld [vmem:[%s138_s25] sm:$0xff]  ;;  %s2008_s25 = smov 64  }
  0x1a   : > { %v154_v1 = vsel %vm153_vm0, %v2084_v0, 0.0 }
  0x1b   : > { %155 = vadd.xlane.f32.xlu0 %v154_v1 }
  0xa8   : > { %v156_v2 = vpop.xlane.xlu0 %155 }
  0xa9   : > { %v158_v3 = vmul.f32 0.03125, %v156_v2 }
  0xab   : > { %v159_v4 = vsub.f32 %v2084_v0, %v158_v3 }
  0xad   : > { %v160_v5 = vmul.f32 %v159_v4, %v159_v4 }
  0xaf   : > { %v161_v6 = vsel %vm153_vm0, %v160_v5, 0.0 }
  0xb0   : > { %162 = vadd.xlane.f32.xlu0 %v161_v6 }
 0x13d   : > { %v163_v15 = vpop.xlane.xlu0 %162 }
 0x13e   : > { %v164_v16 = vmul.f32 0.03125, %v163_v15 }
 0x140   : > { %v165_v18 = vadd.f32 1e-05, %v164_v16  ;;  %v1785_v16 = vpack.c.bf16 %v150_v56, %v149_v55 }
 0x142   : > { %1915 = vrsqrt.f32 %v165_v18  ;;  %v1789_v18 = vpack.c.bf16 %v152_v59, %v151_v58 }
 0x14c   : > { %v1916_v24 = vpop.eup %1915 }
 0x14d   : > { %v167_v25 = vmul.f32 %v1916_v24, %v159_v4 }
 0x14f   : > { %v172_v27 = vmul.f32 %v171_v23, %v167_v25 }
 0x151   : > { %v177_v28 = vadd.f32 %v176_v26, %v172_v27 }
 0x153   : > { %1662 = vmatmul.mubr.msk.f32.vlgmr.msra.gmra.mrb[0].mxu1 %vm153_vm0, %v177_v28 }
 0x154   : > { %1666 = vmatprep.mubr.msk.f32.mxu1 %vm2002_vm1, %v2003_v13 }
 0x226   : > { %v251_v31 = vpop.f32.mrb[0].mxu1 }
 0x227   : > { %v2126_v32 = vadd.f32 %v251_v31, %v181_v30  ;;  %v1663_v33 = vpop.f32.mrb[1].mxu1 }
 0x229   : > { %421 = vrot.lane.b32.xlu0 %v2126_v32, %s2004_s8  ;;  %256 = vrot.lane.b32.xlu1 %v2126_v32, %s2005_s14 }
 0x22d   : > { %423 = vrot.lane.b32.xlu1 %v2126_v32, %s2006_s16 }
 0x29b   : > { %v257_v34 = vpop.permute.xlu1 %256  ;;  %v422_v36 = vpop.permute.xlu0 %421 }
 0x29c   : > { %1665 = vmatpush3.xpose.msk.msra.mxu1 %vm258_vm2, %v257_v34 }
 0x29d   : > { %1669 = vmatprep.subr.mxu1 %v2003_v13 }
 0x29f   : > { %1667 = vmatmul.mubr.msk.f32.vlgmr.msra.gmra.mrb[2].mxu1 %vm258_vm2, %v2126_v32  ;;  %v424_v35 = vpop.permute.xlu1 %423 }
 0x2a0   : > { %1675 = vmatpush3.xpose.msk.msra.mxu0 %vm258_vm2, %v424_v35  ;;  %1671 = vmatprep.mubr.msk.f32.mxu1 %vm2002_vm1, %v2003_v13 }
 0x2a1   : > { %1776 = vmatprep.subr.bf16.mxu0 %v2001_v10 }
 0x2a3   : > { %1677 = vmatmul.mubr.msk.f32.vlgmr.msra.gmra.mrb[0].mxu0 %vm258_vm2, %v422_v36 }
 0x2a4   : > { %1692 = vmatprep.mubr.msk.f32.mxu0 %vm2002_vm1, %v2003_v13 }
 0x372   : > { %v329_v37 = vpop.f32.mrb[2].mxu1 }
 0x373   : > { %v333_v38 = vmul.f32 0.35355338, %v329_v37  ;;  %v1668_v39 = vpop.f32.mrb[3].mxu1 }
 0x375   : > { %v334_v40 = vsel %vm258_vm2, %v333_v38, -inf }
 0x376   : > { %v495_v41 = vpop.f32.mrb[0].mxu0  ;;  %335 = vmax.xlane.f32.xlu1 %v334_v40 }
 0x377   : > { %v499_v42 = vmul.f32 0.35355338, %v495_v41  ;;  %v1678_v43 = vpop.f32.mrb[1].mxu0 }
 0x379   : > { %v500_v44 = vsel %vm258_vm2, %v499_v42, -inf }
 0x37a   : > { %501 = vmax.xlane.f32.xlu0 %v500_v44 }
 0x390   : > { %511 = vrot.lane.b32.xlu0 %v2126_v32, %s2007_s17 }
 0x403   : > { %v336_v45 = vpop.xlane.xlu1 %335 }
 0x404   : > { %v337_v46 = vsub.f32 %v333_v38, %v336_v45 }
 0x406   : > { %v338_v47 = vmul.f32 1.442695, %v337_v46 }
 0x407   : > { %v502_v48 = vpop.xlane.xlu0 %501 }
 0x408   : > { %1917 = vpow2.f32 %v338_v47  ;;  %v503_v49 = vsub.f32 %v499_v42, %v502_v48 }
 0x40a   : > { %v504_v50 = vmul.f32 1.442695, %v503_v49 }
 0x40b   : > { %v512_v6 = vpop.permute.xlu0 %511 }
 0x40c   : > { %1919 = vpow2.f32 %v504_v50 }
 0x412   : > { %v1918_v51 = vpop.eup %1917 }
 0x413   : > { %v340_v52 = vsel %vm258_vm2, %v1918_v51, 0.0 }
 0x414   : > { %341 = vadd.xlane.f32.xlu1 %v340_v52 }
 0x416   : > { %v1920_v53 = vpop.eup %1919 }
 0x417   : > { %v506_v54 = vsel %vm258_vm2, %v1920_v53, 0.0 }
 0x418   : > { %507 = vadd.xlane.f32.xlu1 %v506_v54 }
 0x429   : > { %345 = vrot.lane.b32.xlu1 %v2126_v32, %s2008_s25 }
 0x42d   : > { %1876 = vrot.lane.b32.xlu1 %v2156_v57, %s2004_s8 }
 0x431   : > { %1881 = vrot.lane.b32.xlu1 %v2166_v60, %s2004_s8 }
 0x435   : > { %763 = vrot.lane.b32.xlu1 %v2126_v32, %s2009_s30 }
 0x439   : > { %761 = vrot.lane.b32.xlu1 %v2126_v32, %s2010_s3 }
 0x4a1   : > { %v342_v61 = vpop.xlane.xlu1 %341 }
 0x4a2   : > { %1921 = vrcp.f32 %v342_v61 }
 0x4a5   : > { %v508_v62 = vpop.xlane.xlu1 %507 }
 0x4a6   : > { %1923 = vrcp.f32 %v508_v62 }
 0x4a9   : > { %v346_v63 = vpop.permute.xlu1 %345 }
 0x4aa   : > { %1670 = vmatpush3.msra.mxu1 %v346_v63 }
 0x4ab   : > { %1679 = vmatprep.subr.mxu1 %v2003_v13 }
 0x4ac   : > { %v1922_v1 = vpop.eup %1921 }
 0x4ad   : > { %v344_v2 = vmul.f32 %v1922_v1, %v1918_v51  ;;  %v1877_v3 = vpop.permute.xlu1 %1876 }
 0x4ae   : > { %v1879_v4 = vunpack.i.h.bf16 %v1877_v3  ;;  %v1878_v5 = vunpack.i.l.bf16 %v1877_v3 }
 0x4af   : > { %1672 = vmatmul.mubr.msk.f32.vlgmr.msra.gmra.mrb[4].mxu1 %vm258_vm2, %v344_v2 }
 0x4b0   : > { %v1924_v7 = vpop.eup %1923  ;;  %v1777_v8 = vpack.c.bf16 %v1879_v4, %v1878_v5  ;;  %1680 = vmatpush3.msra.mxu1 %v512_v6  ;;  %1681 = vmatprep.mubr.msk.f32.mxu1 %vm2002_vm1, %v2003_v13 }
 0x4b1   : > { %v510_v9 = vmul.f32 %v1924_v7, %v1920_v53  ;;  %v1882_v11 = vpop.permute.xlu1 %1881  ;;  %1784 = vmatprep.subr.bf16.mxu1 %v2001_v10 }
 0x4b2   : > { %v1884_v14 = vunpack.i.h.bf16 %v1882_v11  ;;  %v1883_v15 = vunpack.i.l.bf16 %v1882_v11  ;;  %1779 = vmatpush3.bf16.xpose.msk.msra.mxu0 %vm2180_vm3, %v1777_v8 }
 0x4b3   : > { %1682 = vmatmul.mubr.msk.f32.vlgmr.msra.gmra.mrb[6].mxu1 %vm258_vm2, %v510_v9  ;;  %1780 = vmatprep.subr.bf16.mxu0 %v2001_v10 }
 0x4b4   : > { %1703 = vmatprep.mubr.msk.f32.mxu1 %vm2002_vm1, %v2003_v13  ;;  %v1781_v17 = vpack.c.bf16 %v1884_v14, %v1883_v15 }
 0x4b5   : > { %v764_v23 = vpop.permute.xlu1 %763 }
 0x4b7   : > { %1787 = vmatpush3.bf16.xpose.msk.msra.mxu1 %vm2180_vm3, %v1785_v16 }
 0x4b8   : > { %1788 = vmatprep.subr.bf16.mxu1 %v2001_v10 }
 0x4b9   : > { %v762_v26 = vpop.permute.xlu1 %761 }
 0x4ba   : > { %1783 = vmatpush3.bf16.xpose.msk.msra.mxu0 %vm2180_vm3, %v1781_v17 }
 0x4bb   : > { %1706 = vmatprep.subr.mxu0 %v2003_v13 }
 0x4bf   : > { %1791 = vmatpush3.bf16.xpose.msk.msra.mxu1 %vm2180_vm3, %v1789_v18 }
 0x4c0   : > { %1711 = vmatprep.subr.mxu1 %v2003_v13 }
 0x582   : > { %v417_v20 = vpop.f32.mrb[4].mxu1 }
 0x583   : > { %v1673_v22 = vpop.f32.mrb[5].mxu1  ;;  %1704 = vmatmul.mubr.msk.f32.vlgmr.msra.gmra.mrb[8].mxu1 %vm258_vm2, %v417_v20 }
 0x584   : > { %1713 = vmatprep.mubr.msk.f32.mxu1 %vm2002_vm1, %v2003_v13 }
 0x586   : > { %v583_v24 = vpop.f32.mrb[6].mxu1 }
 0x587   : > { %v1683_v25 = vpop.f32.mrb[7].mxu1  ;;  %1693 = vmatmul.mubr.msk.f32.vlgmr.msra.gmra.mrb[2].mxu0 %vm258_vm2, %v583_v24 }
 0x588   : > { %1707 = vmatpush3.xpose.msk.msra.mxu0 %vm258_vm2, %v764_v23  ;;  %1708 = vmatprep.mubr.msk.f32.mxu0 %vm2002_vm1, %v2003_v13 }
 0x589   : > { %1792 = vmatprep.subr.bf16.mxu0 %v2001_v10 }
 0x58b   : > { %1709 = vmatmul.mubr.msk.f32.vlgmr.msra.gmra.mrb[4].mxu0 %vm258_vm2, %v762_v26 }
 0x58c   : > { %1724 = vmatprep.mubr.msk.f32.mxu0 %vm2002_vm1, %v2003_v13 }
 0x656   : > { %v757_v27 = vpop.f32.mrb[8].mxu1 }
 0x657   : > { %v1705_v28 = vpop.f32.mrb[9].mxu1 }
 0x65a   : > { %v676_v29 = vpop.f32.mrb[2].mxu0 }
 0x65b   : > { %v2210_v30 = vadd.f32 %v757_v27, %v676_v29  ;;  %v1694_v31 = vpop.f32.mrb[3].mxu0  ;;  %v1275_v27 = vsub.s32 1, %v2110_v19 }
 0x65d   : > { %v1276_v28 = vrot.slane %v2116_v21, %v1275_v27 }
 0x65e   : > { %v835_v33 = vpop.f32.mrb[4].mxu0 }
 0x65f   : > { %v839_v34 = vmul.f32 0.35355338, %v835_v33  ;;  %v1710_v35 = vpop.f32.mrb[5].mxu0 }
 0x661   : > { %v840_v36 = vsel %vm258_vm2, %v839_v34, -inf }
 0x662   : > { %841 = vmax.xlane.f32.xlu0 %v840_v36 }
 0x678   : > { %851 = vrot.lane.b32.xlu0 %v2126_v32, %s2011_s4  ;;  %s2306_s4 = scalar_lea.hbm %s2351_s2, %s1599_s27 }
 0x67c   : > { %1017 = vrot.lane.b32.xlu0 %v2126_v32, %s2012_s5 }
 0x6ef   : > { %v842_v37 = vpop.xlane.xlu0 %841 }
 0x6f0   : > { %v843_v38 = vsub.f32 %v839_v34, %v842_v37 }
 0x6f2   : > { %v844_v39 = vmul.f32 1.442695, %v843_v38 }
 0x6f3   : > { %v852_v40 = vpop.permute.xlu0 %851 }
 0x6f4   : > { %1925 = vpow2.f32 %v844_v39  ;;  %1712 = vmatpush3.msra.mxu1 %v852_v40  ;;  %v145_v40 = vld [vmem:[%s2350_s1 + $0x28] sm:$0xff] }
 0x6f5   : > { %1727 = vmatprep.subr.mxu1 %v2003_v13 }
 0x6f7   : > { %v1018_v47 = vpop.permute.xlu0 %1017 }
 0x6fe   : > { %v1926_v41 = vpop.eup %1925 }
 0x6ff   : > { %v846_v42 = vsel %vm258_vm2, %v1926_v41, 0.0 }
 0x700   : > { %847 = vadd.xlane.f32.xlu1 %v846_v42  ;;  %v147_v42 = vld [vmem:[%s2350_s1 + $0x38] sm:$0xff] }
 0x711   : > { %1019 = vrot.lane.b32.xlu1 %v2126_v32, %s2013_s6  ;;  %s2015_s6 = smov [#allocation2]  }
 0x78d   : > { %v848_v43 = vpop.xlane.xlu1 %847 }
 0x78e   : > { %1927 = vrcp.f32 %v848_v43  ;;  %v148_v43 = vld [vmem:[%s2350_s1 + $0x40] sm:$0xff] }
 0x791   : > { %v1020_v46 = vpop.permute.xlu1 %1019 }
 0x798   : > { %v1928_v44 = vpop.eup %1927 }
 0x799   : > { %v850_v45 = vmul.f32 %v1928_v44, %v1926_v41  ;;  %v1812_v44 = vpack.c.bf16 %v148_v43, %v147_v42 }
 0x79b   : > { %1714 = vmatmul.mubr.msk.f32.vlgmr.msra.gmra.mrb[10].mxu1 %vm258_vm2, %v850_v45 }
 0x79c   : > { %1728 = vmatpush3.xpose.msk.msra.mxu1 %vm258_vm2, %v1020_v46  ;;  %1729 = vmatprep.mubr.msk.f32.mxu1 %vm2002_vm1, %v2003_v13 }
 0x79d   : > { %1732 = vmatprep.subr.mxu1 %v2003_v13 }
 0x79f   : > { %1730 = vmatmul.mubr.msk.f32.vlgmr.msra.gmra.mrb[12].mxu1 %vm258_vm2, %v1018_v47 }
 0x7a0   : > { %1734 = vmatprep.mubr.msk.f32.mxu1 %vm2002_vm1, %v2003_v13 }
 0x86e   : > { %v923_v48 = vpop.f32.mrb[10].mxu1 }
 0x86f   : > { %v1715_v49 = vpop.f32.mrb[11].mxu1 }
 0x870   : > { %v1299_v49 = vsub.s32 7, %v2110_v19 }
 0x872   : > { %v1091_v50 = vpop.f32.mrb[12].mxu1 }
 0x873   : > { %v1095_v51 = vmul.f32 0.35355338, %v1091_v50  ;;  %v1731_v52 = vpop.f32.mrb[13].mxu1 }
 0x875   : > { %v1096_v53 = vsel %vm258_vm2, %v1095_v51, -inf }
 0x876   : > { %1097 = vmax.xlane.f32.xlu1 %v1096_v53  ;;  %v1300_v53 = vrot.slane %v2116_v21, %v1299_v49 }
 0x887   : > { %1886 = vrot.lane.b32.xlu1 %v2156_v57, %s2010_s3 }
 0x88b   : > { %1891 = vrot.lane.b32.xlu1 %v2156_v57, %s2012_s5 }
 0x88f   : > { %1901 = vrot.lane.b32.xlu1 %v2166_v60, %s2012_s5 }
 0x903   : > { %v1098_v54 = vpop.xlane.xlu1 %1097 }
 0x904   : > { %v1099_v55 = vsub.f32 %v1095_v51, %v1098_v54 }
 0x906   : > { %v1100_v56 = vmul.f32 1.442695, %v1099_v55 }
 0x907   : > { %v1887_v61 = vpop.permute.xlu1 %1886 }
 0x908   : > { %1929 = vpow2.f32 %v1100_v56  ;;  %v1889_v62 = vunpack.i.h.bf16 %v1887_v61  ;;  %v1888_v63 = vunpack.i.l.bf16 %v1887_v61 }
 0x90a   : > { %v1793_v1 = vpack.c.bf16 %v1889_v62, %v1888_v63 }
 0x90b   : > { %v1892_v5 = vpop.permute.xlu1 %1891 }
 0x90c   : > { %1795 = vmatpush3.bf16.xpose.msk.msra.mxu0 %vm2180_vm3, %v1793_v1  ;;  %v1893_v8 = vunpack.i.l.bf16 %v1892_v5  ;;  %v1304_v1 = vsub.s32 2, %v2110_v19 }
 0x90d   : > { %1796 = vmatprep.subr.bf16.mxu0 %v2001_v10 }
 0x90f   : > { %v1902_v16 = vpop.permute.xlu1 %1901 }
 0x910   : > { %v1904_v17 = vunpack.i.h.bf16 %v1902_v16  ;;  %v1903_v18 = vunpack.i.l.bf16 %v1902_v16 }
 0x912   : > { %v1930_v58 = vpop.eup %1929  ;;  %v1805_v20 = vpack.c.bf16 %v1904_v17, %v1903_v18 }
 0x913   : > { %v1102_v59 = vsel %vm258_vm2, %v1930_v58, 0.0 }
 0x914   : > { %1103 = vadd.xlane.f32.xlu0 %v1102_v59 }
 0x92a   : > { %1107 = vrot.lane.b32.xlu0 %v2126_v32, %s2014_s7  ;;  %v1894_v32 = vunpack.i.h.bf16 %v1892_v5  ;;  %s1941_s7 = sshll.u32 %s2015_s6, 4  ;;  %s1942_s7 = int_to_ptr.vmem [resolvable:$false] %s1941_s7 }
 0x92b   : > { %s1943_s8 = scalar_lea.vmem %s1942_s7, 256 }
 0x92c   : > { %v1801_v14 = vpack.c.bf16 %v1894_v32, %v1893_v8  ;;  %v1386_v8 = vsub.s32 3, %v2110_v19 }
 0x92e   : > { %1896 = vrot.lane.b32.xlu0 %v2166_v60, %s2010_s3 }
 0x9a1   : > { %v1104_v2 = vpop.xlane.xlu0 %1103 }
 0x9a2   : > { %1931 = vrcp.f32 %v1104_v2 }
 0x9a5   : > { %v1108_v3 = vpop.permute.xlu0 %1107 }
 0x9a6   : > { %1733 = vmatpush3.msra.mxu1 %v1108_v3 }
 0x9a7   : > { %1800 = vmatprep.subr.bf16.mxu1 %v2001_v10 }
 0x9a9   : > { %v1897_v4 = vpop.permute.xlu0 %1896 }
 0x9aa   : > { %v1899_v6 = vunpack.i.h.bf16 %v1897_v4  ;;  %v1898_v7 = vunpack.i.l.bf16 %v1897_v4 }
 0x9ac   : > { %v1932_v9 = vpop.eup %1931  ;;  %v1797_v11 = vpack.c.bf16 %v1899_v6, %v1898_v7 }
 0x9ad   : > { %v1106_v15 = vmul.f32 %v1932_v9, %v1930_v58  ;;  %v1387_v9 = vrot.slane %v2116_v21, %v1386_v8 }
 0x9ae   : > { %1799 = vmatpush3.bf16.xpose.msk.msra.mxu0 %vm2180_vm3, %v1797_v11 }
 0x9af   : > { %1735 = vmatmul.mubr.msk.f32.vlgmr.msra.gmra.mrb[14].mxu1 %vm258_vm2, %v1106_v15  ;;  %1808 = vmatprep.subr.bf16.mxu0 %v2001_v10 }
 0x9b0   : > { %1803 = vmatpush3.bf16.xpose.msk.msra.mxu1 %vm2180_vm3, %v1801_v14  ;;  %1745 = vmatprep.mubr.msk.f32.mxu1 %vm2002_vm1, %v2003_v13 }
 0x9b1   : > { %1804 = vmatprep.subr.bf16.mxu1 %v2001_v10 }
 0x9b5   : > { %1725 = vmatmul.mubr.msk.f32.vlgmr.msra.gmra.mrb[6].mxu0 %vm258_vm2, %v923_v48  ;;  %v1294_v48 = vsub.s32 6, %v2110_v19 }
 0x9b6   : > { %1756 = vmatprep.mubr.msk.f32.mxu0 %vm2002_vm1, %v2003_v13 }
 0x9b7   : > { %v1295_v50 = vrot.slane %v2116_v21, %v1294_v48 }
 0x9b8   : > { %1807 = vmatpush3.bf16.xpose.msk.msra.mxu1 %vm2180_vm3, %v1805_v20 }
 0xa82   : > { %v1179_v22 = vpop.f32.mrb[14].mxu1 }
 0xa83   : > { %v1736_v23 = vpop.f32.mrb[15].mxu1  ;;  %1746 = vmatmul.mubr.msk.f32.vlgmr.msra.gmra.mrb[16].mxu1 %vm258_vm2, %v1179_v22 }
 0xa88   : > { %v1012_v24 = vpop.f32.mrb[6].mxu0 }
 0xa89   : > { %v1016_v25 = vadd.f32 %v1012_v24, %v2210_v30  ;;  %v1726_v26 = vpop.f32.mrb[7].mxu0 }
 0xb56   : > { %v1268_v29 = vpop.f32.mrb[16].mxu1 }
 0xb57   : > { %v1272_v31 = vadd.f32 %v1268_v29, %v1016_v25  ;;  %v1747_v33 = vpop.f32.mrb[17].mxu1 }
 0xb59   : > { %v1277_v34 = vadd.f32 %v1276_v28, %v1272_v31 }
 0xb5b   : > { %v2261_v35 = vadd.f32 %v1277_v34, %v2084_v0  ;;  %v146_v0 = vld [vmem:[%s2350_s1 + $0x30] sm:$0xff] }
 0xb5c   : > { %v1809_v41 = vpack.c.bf16 %v146_v0, %v145_v40 }
 0xb5d   : > { %v1279_v12 = vsel %vm153_vm0, %v2261_v35, 0.0 }
 0xb5e   : > { %1280 = vadd.xlane.f32.xlu0 %v1279_v12  ;;  %1810 = vmatpush3.bf16.msra.mxu0 %v1809_v41 }
 0xb5f   : > { %1811 = vmatprep.subr.bf16.mxu0 %v2001_v10 }
 0xb62   : > { %1813 = vmatpush3.bf16.msra.mxu0 %v1812_v44 }
 0xb63   : > { %1814 = vmatprep.subr.bf16.mxu0 %v2001_v10 }
 0xb74   : > { %1906 = vrot.lane.b32.xlu0 %v2156_v57, %s2005_s14 }
 0xbeb   : > { %v1281_v36 = vpop.xlane.xlu0 %1280 }
 0xbec   : > { %v1282_v37 = vmul.f32 0.03125, %v1281_v36 }
 0xbee   : > { %v1283_v30 = vsub.f32 %v2261_v35, %v1282_v37 }
 0xbef   : > { %v1907_v57 = vpop.permute.xlu0 %1906 }
 0xbf0   : > { %v1284_v38 = vmul.f32 %v1283_v30, %v1283_v30  ;;  %v1908_v56 = vunpack.i.l.bf16 %v1907_v57 }
 0xbf2   : > { %v1285_v39 = vsel %vm153_vm0, %v1284_v38, 0.0 }
 0xbf3   : > { %1286 = vadd.xlane.f32.xlu1 %v1285_v39 }
 0xc04   : > { %1911 = vrot.lane.b32.xlu1 %v2166_v60, %s2005_s14  ;;  %v1909_v60 = vunpack.i.h.bf16 %v1907_v57  ;;  %s132_s14 = sand.u32 1, %s1991_s10  }
 0xc05   : > { %s1557_s26 = sshll.u32 %s132_s14, 3  ;;  %s1481_s5 = scalar_lea.sflag [#allocation3], %s132_s14 }
 0xc06   : > { %v1815_v58 = vpack.c.bf16 %v1909_v60, %v1908_v56  ;;  %s134_s28 = scalar_lea.vmem [#allocation2], %s1557_s26 }
 0xc07   : > { %s1494_s29 = sshll.u32 %s134_s28, 4  ;;  %s2308_s29 = int_to_ptr.vmem [resolvable:$true] %s1494_s29 }
 0xc08   : > { %s1937_s13 = scalar_lea.vmem %s2308_s29, 128  ;;  %p1944_p0 = scmp.lt.s32.totalorder %s2308_s29, %s1942_s7 }
 0xc09   : > { %p1938_p11 = scmp.ne.s32.totalorder %s2308_s29, %s1937_s13  ;;  %p1945_p1 = scmp.lt.s32.totalorder %s1943_s8, %s1937_s13 }
 0xc0b   : > { %p1939_p12 = pnand %p1938_p11, %p2069_p5  ;;  %p1946_p2 = por %p1945_p1, %p1944_p0 }
 0xc0d   : > { %p1940_p13 = pneg %p1939_p12 }
 0xc0f   : > { %p1947_p3 = pnand %p1946_p2, %p1940_p13 }
 0xc80   : > { %v1287_v45 = vpop.xlane.xlu1 %1286 }
 0xc81   : > { %v1288_v46 = vmul.f32 0.03125, %v1287_v45 }
 0xc83   : > { %v1289_v47 = vadd.f32 1e-05, %v1288_v46 }
 0xc84   : > { %v1912_v59 = vpop.permute.xlu1 %1911 }
 0xc85   : > { %1933 = vrsqrt.f32 %v1289_v47  ;;  %v1914_v61 = vunpack.i.h.bf16 %v1912_v59  ;;  %v1913_v62 = vunpack.i.l.bf16 %v1912_v59 }
 0xc87   : > { %v1819_v63 = vpack.c.bf16 %v1914_v61, %v1913_v62 }
 0xc8f   : > { %v1934_v51 = vpop.eup %1933 }
 0xc90   : > { %v1291_v52 = vmul.f32 %v1934_v51, %v1283_v30 }
 0xc92   : > { %v1296_v54 = vmul.f32 %v1295_v50, %v1291_v52 }
 0xc94   : > { %v1301_v55 = vadd.f32 %v1300_v53, %v1296_v54 }
 0xc96   : > { %1757 = vmatmul.mubr.msk.f32.vlgmr.msra.gmra.mrb[8].mxu0 %vm153_vm0, %v1301_v55 }
 0xc97   : > { %1767 = vmatprep.mubr.msk.f32.mxu0 %vm2002_vm1, %v2003_v13  ;;  %1817 = vmatpush3.bf16.xpose.msk.msra.mxu0 %vm1816_vm5, %v1815_v58  ;;  %v1305_v13 = vrot.slane %v2116_v21, %v1304_v1 }
 0xc98   : > { %1818 = vmatprep.subr.bf16.mxu0 %v2001_v10 }
 0xc9f   : > { %1821 = vmatpush3.bf16.xpose.msk.msra.mxu0 %vm1816_vm5, %v1819_v63 }
 0xd69   : > { %v1375_v2 = vpop.f32.mrb[8].mxu0 }
 0xd6a   : > { %v1376_v3 = vadd.f32 %v1375_v2, %v1305_v13  ;;  %v1758_v4 = vpop.f32.mrb[9].mxu0 }
 0xd6c   : > { %v1380_v5 = vmul.f32 0.70710677, %v1376_v3  ;;  %v1379_v7 = vmul.f32 0.5, %v1376_v3 }
 0xd6e   : > { %1935 = verf.f32 %v1380_v5 }
 0xd78   : > { %v1936_v6 = vpop.eup %1935 }
 0xd79   : > { %v1382_v32 = vadd.f32 1.0, %v1936_v6 }
 0xd7b   : > { %v1383_v10 = vmul.f32 %v1382_v32, %v1379_v7 }
 0xd7d   : > { %1768 = vmatmul.mubr.msk.f32.vlgmr.msra.gmra.mrb[10].mxu0 %vm1396_vm4, %v1383_v10 }
 0xe50   : > { %v1474_v11 = vpop.f32.mrb[10].mxu0 }
 0xe51   : > { %v1475_v14 = vadd.f32 %v1474_v11, %v1387_v9  ;;  %v1769_v15 = vpop.f32.mrb[11].mxu0 }
 0xe53   : > { %v1478_v16 = vadd.f32 %v1475_v14, %v2261_v35 }
 0xe55   : > { %1479 = vst.msk [vmem:[%s134_s28] sm:$0xff] %vm153_vm0, %v1478_v16 }
 0xe56   : > { %1950 = shalt.err (!%p1947_p3)
}
 0xe57   : > { %s1951_s16 = scalar_lea.hbm %s2306_s4, 128  ;;  %s1955_s22 = scalar_lea.hbm %s2351_s2, 256 }
 0xe58   : > { %p1952_p4 = scmp.ne.s32.totalorder %s2306_s4, %s1951_s16  ;;  %p1956_p9 = scmp.lt.u32.totalorder %s2306_s4, %s2351_s2 }
 0xe59   : > { %p1957_p10 = scmp.lt.u32.totalorder %s1955_s22, %s1951_s16  ;;  %p1959_p12 = scmp.lt.u32.totalorder %s1951_s16, %s2306_s4 }
 0xe5a   : > { %p1953_p7 = pnand %p1952_p4, %p2069_p5 }
 0xe5b   : > { %p1958_p11 = por %p1957_p10, %p1956_p9 }
 0xe5c   : > { %p1954_p8 = pneg %p1953_p7 }
 0xe5d   : > { %p1960_p13 = por %p1959_p12, %p1958_p11 }
 0xe5f   : > { %p1961_p0 = pnand %p1960_p13, %p1954_p8 }
 0xe61   : > { %1964 = shalt.err (!%p1961_p0)
}
 0xe62   : > { %1822 = dma.vmem_to_hbm [thread:$0]  (%p2069_p5), %s2308_s29, 128, %s2306_s4, %s1481_s5  }
 0xe63 PF: > { %p1828_p1 = scmp.ge.s32.totalorder %s1999_s12, 2  ;;  %s1506_s25 = sand.u32 1, %s1987_s9  }
 0xe64   : > { %s1507_s14 = scalar_lea.sflag [#allocation3], %s1506_s25 }
 0xe65   : > { %p1825_p2 = pnand %p1828_p1, %p2073_p6 }
 0xe67   : > { %1982 = dma.done.wait (!%p1825_p2), %s1507_s14, 128  }
 0xe68   : > { %1984 = vsyncadd (!%p1825_p2), %s1507_s14, 4294967168  ;;  %p12_p3 = scmp.ge.s32.totalorder %s2056_s15, 4   ;;  %s2356_s9 = smov %s1991_s10 }
 0xe69   : > { %s2357_s10 = smov %s1995_s11  ;;  %s2358_s11 = smov %s2067_s18 }
 0xe6a   : > { %s2359_s12 = smov %s2056_s15  ;;  %14 = sbr.rel (!%p12_p3) target bundleno = 3 (0x3), region = 63 }
 0xe71   :  { %1512 = vsyncpa [#allocation3], 1 }
 0xe72   :  { %1514 = vsyncpa [#allocation3 + $0x1], 1 }

</bundles_post_ra>
